<compile_context>
chip_gen: v5e
topology: v5e:2x2
jax: 0.10.0
libtpu: 0.0.40
codegen_flags: <defaults>
</compile_context>

<pallas_src>
import functools
import math

import jax
import jax.numpy as jnp
from jax.experimental import pallas as pl
from jax.experimental.pallas import tpu as pltpu


# ----------------------------------------------------------------------------
# Small helpers
# ----------------------------------------------------------------------------
def _pick_tile(dim, target, align):
    """Largest aligned divisor of `dim` <= target; else the smallest aligned
    divisor above target; else the full dim (full dims are exempt from the
    (8,128) rule)."""
    if dim <= target:
        return dim
    t = (target // align) * align
    while t >= align:
        if dim % t == 0:
            return t
        t -= align
    t = ((target + align - 1) // align) * align
    while t < dim:
        if dim % t == 0:
            return t
        t += align
    return dim


def _heads_per_group(num_heads, head_dim):
    """Smallest divisor of num_heads whose combined lane width is a multiple
    of 128 (lane-dense); falls back to all heads (block == full last dim)."""
    for hpg in range(1, num_heads + 1):
        if num_heads % hpg == 0 and (hpg * head_dim) % 128 == 0:
            return hpg
    return num_heads


@functools.lru_cache(maxsize=None)
def _vmem_limit_bytes():
    """Per-generation scoped-VMEM limit: ~75% of physical VMEM, capped at
    100 MiB (v5e/v6e: 96 MiB, v7x: 48 MiB).  Fallback: 48 MiB (safe on all)."""
    try:
        info = pltpu.get_tpu_info()
        cap = getattr(info, "vmem_capacity_bytes", None)
        if cap:
            return int(min(100 * 1024 * 1024, (cap * 3) // 4))
    except Exception:
        pass
    return 48 * 1024 * 1024


def _compiler_params(dim_sem):
    return pltpu.CompilerParams(
        dimension_semantics=dim_sem,
        vmem_limit_bytes=_vmem_limit_bytes(),
    )


# ----------------------------------------------------------------------------
# Kernel 1a: fused QKV projection  ->  out[3, M, H],  out[j] = x @ W[j] + b[j]
#   x: [M, K], w3: [3, K, H], b3: [3, 1, H] (f32)
# ----------------------------------------------------------------------------
def _qkv_kernel_fullk(x_ref, w_ref, b_ref, o_ref):
    o_ref[0] = (
        jnp.dot(x_ref[...], w_ref[0], preferred_element_type=jnp.float32)
        + b_ref[0].astype(jnp.float32)
    ).astype(o_ref.dtype)


def _qkv_kernel_acc(x_ref, w_ref, b_ref, o_ref, acc_ref):
    @pl.when(pl.program_id(2) == 0)
    def _init():
        acc_ref[...] = jnp.zeros_like(acc_ref)

    acc_ref[...] += jnp.dot(
        x_ref[...], w_ref[0], preferred_element_type=jnp.float32
    )

    @pl.when(pl.program_id(2) == pl.num_programs(2) - 1)
    def _flush():
        o_ref[0] = (acc_ref[...] + b_ref[0].astype(jnp.float32)).astype(o_ref.dtype)


def qkv_projection(x, w3, b3, *, out_dtype=None, tm_target=512, tk_target=2048):
    M, K = x.shape
    three, K2, H = w3.shape
    assert three == 3 and K2 == K
    out_dtype = x.dtype if out_dtype is None else out_dtype

    tm = _pick_tile(M, tm_target, 8)
    tk = K if K <= tk_target else _pick_tile(K, tk_target, 128)
    full_k = tk == K

    isz = jnp.dtype(x.dtype).itemsize
    cost = pl.CostEstimate(
        flops=2 * M * 3 * H * K,
        transcendentals=0,
        bytes_accessed=int(
            M * K * isz
            + 3 * K * H * jnp.dtype(w3.dtype).itemsize
            + 3 * M * H * jnp.dtype(out_dtype).itemsize
            + 3 * H * 4
        ),
    )
    out_shape = jax.ShapeDtypeStruct((3, M, H), out_dtype)

    if full_k:
        grid = (M // tm, 3)
        grid_spec = pltpu.PrefetchScalarGridSpec(
            num_scalar_prefetch=0,
            grid=grid,
            in_specs=[
                pl.BlockSpec((tm, K), lambda i, j: (i, 0)),
                pl.BlockSpec((1, K, H), lambda i, j: (j, 0, 0)),
                pl.BlockSpec((1, 1, H), lambda i, j: (j, 0, 0)),
            ],
            out_specs=pl.BlockSpec((1, tm, H), lambda i, j: (j, i, 0)),
        )
        return pl.pallas_call(
            _qkv_kernel_fullk,
            out_shape=out_shape,
            grid_spec=grid_spec,
            compiler_params=_compiler_params(("parallel", "parallel")),
            cost_estimate=cost,
        )(x, w3, b3)

    grid = (M // tm, 3, K // tk)
    grid_spec = pltpu.PrefetchScalarGridSpec(
        num_scalar_prefetch=0,
        grid=grid,
        in_specs=[
            pl.BlockSpec((tm, tk), lambda i, j, k: (i, k)),
            pl.BlockSpec((1, tk, H), lambda i, j, k: (j, k, 0)),
            pl.BlockSpec((1, 1, H), lambda i, j, k: (j, 0, 0)),
        ],
        out_specs=pl.BlockSpec((1, tm, H), lambda i, j, k: (j, i, 0)),
        scratch_shapes=[pltpu.VMEM((tm, H), jnp.float32)],
    )
    return pl.pallas_call(
        _qkv_kernel_acc,
        out_shape=out_shape,
        grid_spec=grid_spec,
        compiler_params=_compiler_params(("parallel", "parallel", "arbitrary")),
        cost_estimate=cost,
    )(x, w3, b3)


# ----------------------------------------------------------------------------
# Kernel 1b: plain linear layer  y = x @ W + b  (used for the output proj)
# ----------------------------------------------------------------------------
def _linear_kernel_fullk(x_ref, w_ref, b_ref, o_ref):
    o_ref[...] = (
        jnp.dot(x_ref[...], w_ref[...], preferred_element_type=jnp.float32)
        + b_ref[...].astype(jnp.float32)
    ).astype(o_ref.dtype)


def _linear_kernel_acc(x_ref, w_ref, b_ref, o_ref, acc_ref):
    @pl.when(pl.program_id(2) == 0)
    def _init():
        acc_ref[...] = jnp.zeros_like(acc_ref)

    acc_ref[...] += jnp.dot(
        x_ref[...], w_ref[...], preferred_element_type=jnp.float32
    )

    @pl.when(pl.program_id(2) == pl.num_programs(2) - 1)
    def _flush():
        o_ref[...] = (acc_ref[...] + b_ref[...].astype(jnp.float32)).astype(o_ref.dtype)


def linear(x, w, b, *, out_dtype=None, tm_target=512, tn_target=512,
           tk_target=2048):
    M, K = x.shape
    K2, N = w.shape
    assert K == K2 and b.shape == (N,)
    out_dtype = x.dtype if out_dtype is None else out_dtype

    tm = _pick_tile(M, tm_target, 8)
    tn = _pick_tile(N, tn_target, 128)
    tk = K if K <= tk_target else _pick_tile(K, tk_target, 128)
    full_k = tk == K

    isz = jnp.dtype(x.dtype).itemsize
    cost = pl.CostEstimate(
        flops=2 * M * N * K,
        transcendentals=0,
        bytes_accessed=int(
            M * K * isz
            + K * N * jnp.dtype(w.dtype).itemsize
            + M * N * jnp.dtype(out_dtype).itemsize
            + N * 4
        ),
    )
    out_shape = jax.ShapeDtypeStruct((M, N), out_dtype)
    b2d = b.reshape(1, N)

    if full_k:
        grid = (M // tm, N // tn)
        grid_spec = pltpu.PrefetchScalarGridSpec(
            num_scalar_prefetch=0,
            grid=grid,
            in_specs=[
                pl.BlockSpec((tm, K), lambda i, j: (i, 0)),
                pl.BlockSpec((K, tn), lambda i, j: (0, j)),
                pl.BlockSpec((1, tn), lambda i, j: (0, j)),
            ],
            out_specs=pl.BlockSpec((tm, tn), lambda i, j: (i, j)),
        )
        return pl.pallas_call(
            _linear_kernel_fullk,
            out_shape=out_shape,
            grid_spec=grid_spec,
            compiler_params=_compiler_params(("parallel", "parallel")),
            cost_estimate=cost,
        )(x, w, b2d)

    grid = (M // tm, N // tn, K // tk)
    grid_spec = pltpu.PrefetchScalarGridSpec(
        num_scalar_prefetch=0,
        grid=grid,
        in_specs=[
            pl.BlockSpec((tm, tk), lambda i, j, k: (i, k)),
            pl.BlockSpec((tk, tn), lambda i, j, k: (k, j)),
            pl.BlockSpec((1, tn), lambda i, j, k: (0, j)),
        ],
        out_specs=pl.BlockSpec((tm, tn), lambda i, j, k: (i, j)),
        scratch_shapes=[pltpu.VMEM((tm, tn), jnp.float32)],
    )
    return pl.pallas_call(
        _linear_kernel_acc,
        out_shape=out_shape,
        grid_spec=grid_spec,
        compiler_params=_compiler_params(("parallel", "parallel", "arbitrary")),
        cost_estimate=cost,
    )(x, w, b2d)


# ----------------------------------------------------------------------------
# Kernel 2: attention.  One (batch, head-group, q-tile) per grid step.
#   qkv3: [3, B, S, H]  ->  ctx: [B, S, H],  probs: [B, nH, S, S]
# The 1/sqrt(hd) scale is pre-folded into Wq/bq at param-prep time.
# ----------------------------------------------------------------------------
def _attention_kernel(q_ref, k_ref, v_ref, ctx_ref, probs_ref, *, head_dim):
    # q_ref: (1, 1, tq, cg); k_ref/v_ref: (1, 1, S, cg)
    # ctx_ref: (1, tq, cg);  probs_ref: (1, hpg, tq, S)
    cg = q_ref.shape[-1]
    hpg = cg // head_dim
    ctx_parts = []
    for hh in range(hpg):  # tiny static loop (typically 2 heads per group)
        lo, hi = hh * head_dim, (hh + 1) * head_dim
        q_h = q_ref[0, 0, :, lo:hi]                              # (tq, hd)
        k_h = k_ref[0, 0, :, lo:hi]                              # (S, hd)
        v_h = v_ref[0, 0, :, lo:hi]                              # (S, hd)

        # QK^T without materializing k.T: contract the last dim of both.
        scores = jax.lax.dot_general(
            q_h, k_h,
            dimension_numbers=(((1,), (1,)), ((), ())),
            preferred_element_type=jnp.float32,
        )                                                        # (tq, S) f32

        m = jnp.max(scores, axis=-1, keepdims=True)
        e = jnp.exp(scores - m)
        denom = jnp.sum(e, axis=-1, keepdims=True)
        probs = e * pl.reciprocal(denom, approx=False)           # exact probs
        probs_ref[0, hh] = probs.astype(probs_ref.dtype)

        ctx_parts.append(
            jnp.dot(probs.astype(v_h.dtype), v_h,
                    preferred_element_type=jnp.float32)          # (tq, hd)
        )

    ctx = ctx_parts[0] if hpg == 1 else jnp.concatenate(ctx_parts, axis=-1)
    ctx_ref[0] = ctx.astype(ctx_ref.dtype)                       # 1 lane-dense store


def attention(qkv3, num_heads, *, probs_dtype=jnp.float32, q_tile_target=512):
    three, B, S, H = qkv3.shape
    assert three == 3
    head_dim = H // num_heads
    hpg = _heads_per_group(num_heads, head_dim)   # lane-dense head group
    cg = hpg * head_dim
    num_groups = num_heads // hpg
    tq = _pick_tile(S, q_tile_target, 8)

    kernel = functools.partial(_attention_kernel, head_dim=head_dim)

    in_specs = [
        pl.BlockSpec((1, 1, tq, cg), lambda b, g, qi: (0, b, qi, g)),   # Q
        pl.BlockSpec((1, 1, S, cg), lambda b, g, qi: (1, b, 0, g)),     # K
        pl.BlockSpec((1, 1, S, cg), lambda b, g, qi: (2, b, 0, g)),     # V
    ]
    out_specs = (
        pl.BlockSpec((1, tq, cg), lambda b, g, qi: (b, qi, g)),         # ctx [B,S,H]
        pl.BlockSpec((1, hpg, tq, S), lambda b, g, qi: (b, g, qi, 0)),  # probs
    )
    out_shape = (
        jax.ShapeDtypeStruct((B, S, H), qkv3.dtype),
        jax.ShapeDtypeStruct((B, num_heads, S, S), probs_dtype),
    )

    isz = jnp.dtype(qkv3.dtype).itemsize
    cost = pl.CostEstimate(
        flops=4 * B * num_heads * S * S * head_dim,
        transcendentals=B * num_heads * S * S,
        bytes_accessed=int(
            3 * B * S * H * isz
            + B * S * H * isz
            + B * num_heads * S * S * jnp.dtype(probs_dtype).itemsize
        ),
    )

    return pl.pallas_call(
        kernel,
        out_shape=out_shape,
        grid_spec=pltpu.PrefetchScalarGridSpec(
            num_scalar_prefetch=0,
            grid=(B, num_groups, S // tq),
            in_specs=in_specs,
            out_specs=out_specs,
        ),
        compiler_params=_compiler_params(("parallel", "parallel", "arbitrary")),
        cost_estimate=cost,
    )(qkv3, qkv3, qkv3)


# ----------------------------------------------------------------------------
# Parameter prep (hoisted out of the forward path) + forward pass
# ----------------------------------------------------------------------------
def prepare_params(params, num_heads, hidden_size, *, compute_dtype=jnp.bfloat16):
    head_dim = hidden_size // num_heads
    scale = 1.0 / math.sqrt(head_dim)
    # Fold 1/sqrt(hd) into the query projection in f32.
    wq = params["wq"] * scale
    bq = params["bq"] * scale
    w_qkv = jnp.stack([wq, params["wk"], params["wv"]], axis=0).astype(compute_dtype)
    b_qkv = jnp.stack([bq, params["bk"], params["bv"]], axis=0).reshape(
        3, 1, hidden_size
    )  # biases stay f32 (added after f32 accumulation)
    return {
        "w_qkv": w_qkv,                                  # [3, H, H]
        "b_qkv": b_qkv,                                  # [3, 1, H] f32
        "wo": params["wo"].astype(compute_dtype),        # [H, H]
        "bo": params["bo"],                              # [H] f32
        "compute_dtype": compute_dtype,
    }


def multi_head_attention(hidden_states, prepped, num_heads, *,
                         probs_dtype=jnp.float32):
    B, S, H = hidden_states.shape
    cdt = prepped["compute_dtype"]

    x2d = hidden_states.reshape(B * S, H).astype(cdt)
    # Fused QKV projection, written directly as [3, B*S, H] (free reshape).
    qkv = qkv_projection(x2d, prepped["w_qkv"], prepped["b_qkv"], out_dtype=cdt)
    qkv = qkv.reshape(3, B, S, H)

    ctx, probs = attention(qkv, num_heads, probs_dtype=probs_dtype)

    # ctx is already [B, S, H] (lane-dense) -> flattening is free.
    out = linear(
        ctx.reshape(B * S, H), prepped["wo"], prepped["bo"], out_dtype=jnp.float32
    ).reshape(B, S, H)
    return out, probs


# ----------------------------------------------------------------------------
# Init + pure-JAX reference
# ----------------------------------------------------------------------------
def init_params(key, hidden_size):
    ks = jax.random.split(key, 8)
    scale = 1.0 / math.sqrt(hidden_size)

    def w(k):
        return jax.random.uniform(
            k, (hidden_size, hidden_size), jnp.float32, -scale, scale
        )

    def b(k):
        return jax.random.uniform(k, (hidden_size,), jnp.float32, -scale, scale)

    return {
        "wq": w(ks[0]), "bq": b(ks[1]),
        "wk": w(ks[2]), "bk": b(ks[3]),
        "wv": w(ks[4]), "bv": b(ks[5]),
        "wo": w(ks[6]), "bo": b(ks[7]),
    }


def reference(hidden_states, params, num_heads):
    B, S, H = hidden_states.shape
    hd = H // num_heads

    def lin(x, w, b):
        return jnp.dot(x, w) + b

    q = lin(hidden_states, params["wq"], params["bq"])
    k = lin(hidden_states, params["wk"], params["bk"])
    v = lin(hidden_states, params["wv"], params["bv"])

    def sh(t):
        return t.reshape(B, S, num_heads, hd).transpose(0, 2, 1, 3)

    qh, kh, vh = sh(q), sh(k), sh(v)
    scores = jnp.einsum("bhqd,bhkd->bhqk", qh, kh) / math.sqrt(hd)
    probs = jax.nn.softmax(scores, axis=-1)
    ctx = jnp.einsum("bhqk,bhkd->bhqd", probs, vh)
    ctx = ctx.transpose(0, 2, 1, 3).reshape(B, S, H)
    out = lin(ctx, params["wo"], params["bo"])
    return out, probs


if __name__ == "__main__":
    # True-f32 matmuls on both the reference and the kernels so the strict
    # comparison is apples-to-apples (bf16 inputs are unaffected).
    jax.config.update("jax_default_matmul_precision", "highest")

    B, S, H, NUM_HEADS = 2, 8, 32, 4

    key = jax.random.PRNGKey(0)
    k_x, k_p = jax.random.split(key)
    x = jax.random.normal(k_x, (B, S, H), dtype=jnp.float32)
    params = init_params(k_p, H)

    ref_out, ref_w = reference(x, params, NUM_HEADS)

    # f32 compute path: strict check.
    prepped_f32 = prepare_params(params, NUM_HEADS, H, compute_dtype=jnp.float32)
    out, weights = multi_head_attention(x, prepped_f32, NUM_HEADS)
    out = jax.block_until_ready(out)
    weights = jax.block_until_ready(weights)
    assert out.shape == (B, S, H)
    assert weights.shape == (B, NUM_HEADS, S, S)
    assert jnp.allclose(out, ref_out, atol=1e-3, rtol=1e-3)
    assert jnp.allclose(weights, ref_w, atol=1e-3, rtol=1e-3)

    # bf16 MXU path (production config): looser tolerance.
    prepped_bf16 = prepare_params(params, NUM_HEADS, H, compute_dtype=jnp.bfloat16)
    out_bf, w_bf = multi_head_attention(x, prepped_bf16, NUM_HEADS)
    out_bf = jax.block_until_ready(out_bf)
    w_bf = jax.block_until_ready(w_bf)
    assert jnp.allclose(out_bf, ref_out, atol=1e-1, rtol=1e-1)
    assert jnp.allclose(w_bf.astype(jnp.float32), ref_w, atol=1e-1, rtol=1e-1)

    print("KERNEL_OK")
</pallas_src>

<mosaic_0001>
module attributes {stable_mosaic.version = 11 : i64} {
  func.func @_qkv_kernel_fullk(%arg0: i32, %arg1: i32, %arg2: memref<16x32xf32, #tpu.memory_space<vmem>>, %arg3: memref<1x32x32xf32, #tpu.memory_space<vmem>>, %arg4: memref<1x1x32xf32, #tpu.memory_space<vmem>>, %arg5: memref<1x16x32xf32, #tpu.memory_space<vmem>>) attributes {dimension_semantics = [#tpu.dimension_semantics<parallel>, #tpu.dimension_semantics<parallel>], iteration_bounds = array<i64: 1, 3>, scalar_prefetch = 0 : i64, scratch_operands = 0 : i64, tpu.core_type = #tpu.core_type<tc>, window_params = [{transform_indices = @transform_0, window_bounds = array<i64: 16, 32>}, {transform_indices = @transform_1, window_bounds = array<i64: 1, 32, 32>}, {transform_indices = @transform_2, window_bounds = array<i64: 1, 1, 32>}, {transform_indices = @transform_3, window_bounds = array<i64: 1, 16, 32>}]} {
    %c0 = arith.constant 0 : index
    %c0_0 = arith.constant 0 : index
    %0 = vector.load %arg2[%c0, %c0_0] : memref<16x32xf32, #tpu.memory_space<vmem>>, vector<16x32xf32>
    %c0_1 = arith.constant 0 : index
    %c0_2 = arith.constant 0 : index
    %c0_3 = arith.constant 0 : index
    %1 = vector.load %arg3[%c0_1, %c0_2, %c0_3] : memref<1x32x32xf32, #tpu.memory_space<vmem>>, vector<1x32x32xf32>
    %2 = vector.shape_cast %1 : vector<1x32x32xf32> to vector<32x32xf32>
    %cst = arith.constant dense<0.000000e+00> : vector<16x32xf32>
    %3 = tpu.matmul %0, %2, %cst {dimension_numbers = #tpu.dot_dimension_numbers<[1], [0], [0], [1], [0, 0, 1, 1], [], []>, precision = #tpu.contract_precision<fp32>} : vector<16x32xf32>, vector<32x32xf32>, vector<16x32xf32> -> vector<16x32xf32>
    %c0_4 = arith.constant 0 : index
    %c0_5 = arith.constant 0 : index
    %c0_6 = arith.constant 0 : index
    %4 = vector.load %arg4[%c0_4, %c0_5, %c0_6] : memref<1x1x32xf32, #tpu.memory_space<vmem>>, vector<1x1x32xf32>
    %5 = vector.shape_cast %4 : vector<1x1x32xf32> to vector<1x32xf32>
    %6 = vector.broadcast %5 : vector<1x32xf32> to vector<16x32xf32>
    %7 = arith.addf %3, %6 : vector<16x32xf32>
    %c0_7 = arith.constant 0 : index
    %c0_8 = arith.constant 0 : index
    %c0_9 = arith.constant 0 : index
    %8 = vector.load %arg5[%c0_7, %c0_8, %c0_9] : memref<1x16x32xf32, #tpu.memory_space<vmem>>, vector<1x16x32xf32>
    %9 = vector.shape_cast %8 : vector<1x16x32xf32> to vector<16x32xf32>
    %10 = vector.shape_cast %7 : vector<16x32xf32> to vector<1x16x32xf32>
    tpu.vector_store %arg5[%c0_7, %c0_8, %c0_9], %10 {strides = array<i32>} : memref<1x16x32xf32, #tpu.memory_space<vmem>>, vector<1x16x32xf32>,
    return
  }
  func.func @transform_0(%arg0: i32, %arg1: i32) -> (i32, i32) {
    %c0_i32 = arith.constant 0 : i32
    %c0_i32_0 = arith.constant 0 : i32
    return %arg0, %c0_i32 : i32, i32
  }
  func.func @transform_1(%arg0: i32, %arg1: i32) -> (i32, i32, i32) {
    %c0_i32 = arith.constant 0 : i32
    %c0_i32_0 = arith.constant 0 : i32
    %c0_i32_1 = arith.constant 0 : i32
    return %arg1, %c0_i32, %c0_i32_0 : i32, i32, i32
  }
  func.func @transform_2(%arg0: i32, %arg1: i32) -> (i32, i32, i32) {
    %c0_i32 = arith.constant 0 : i32
    %c0_i32_0 = arith.constant 0 : i32
    %c0_i32_1 = arith.constant 0 : i32
    return %arg1, %c0_i32, %c0_i32_0 : i32, i32, i32
  }
  func.func @transform_3(%arg0: i32, %arg1: i32) -> (i32, i32, i32) {
    %c0_i32 = arith.constant 0 : i32
    %c0_i32_0 = arith.constant 0 : i32
    return %arg1, %arg0, %c0_i32 : i32, i32, i32
  }
}

</mosaic_0001>

<bundles_post_ra>
// kernel: tpu_custom_call.1
= control target key start
LH: loop header
LB: loop body
LE: loop exit
PB: predicated region body
PF: predicated region fallthrough
CT: control target
= control target key end

     0   :  { %8 = vsyncpa [#allocation3], 0  ;;  %s1160_s0 = inlined_call_operand.hbm [shape: f32[16,32], index: 0, kind: input, shape index: {}]   ;;  %s1161_s1 = inlined_call_operand.hbm [shape: f32[3,32,32], index: 1, kind: input, shape index: {}]   ;;  %s1162_s2 = inlined_call_operand.hbm [shape: f32[3,1,32], index: 2, kind: input, shape index: {}]   ;;  %s1163_s3 = inlined_call_operand.hbm [shape: f32[3,16,32], index: 3, kind: output, shape index: {}]  }
   0x1   :  { %9 = vsyncpa [#allocation6], 0 }
   0x2   :  { %11 = vsyncpa [#allocation6 + $0x1], 0 }
   0x3   :  { %12 = vsyncpa [#allocation4], 0 }
   0x4   :  { %14 = vsyncpa [#allocation4 + $0x1], 0  ;;  %s944_s12 = smov 0   ;;  %s946_s13 = smov 0  }
   0x5   :  { %s948_s14 = smov 0   ;;  %s950_s15 = smov 0  }
   0x6   :  { %s952_s16 = smov 0   ;;  %s954_s17 = smov 0  }
   0x7 LB: > { %s29_s18 = sadd.s32 1, %s913_s16  ;;  %s65_s19 = sadd.s32 1, %s905_s14  ;;  %s917_s17 = sphi %s954_s17, %s20_s17   ;;  %s913_s16 = sphi %s952_s16, %s1174_s16   ;;  %s909_s15 = sphi %s950_s15, %s1173_s15   ;;  %s905_s14 = sphi %s948_s14, %s1172_s14   ;;  %s901_s13 = sphi %s946_s13, %s1171_s13   ;;  %s897_s12 = sphi %s944_s12, %s1170_s12  }
   0x8   : > { %p30_p0 = scmp.ge.s32.totalorder %s29_s18, 3  ;;  %p72_p1 = scmp.ne.s32.totalorder %s905_s14, %s901_s13 }
   0x9   : > { %p73_p2 = scmp.eq.s32.totalorder %s917_s17, 0  ;;  %p684_p5 = scmp.lt.s32.totalorder %s917_s17, 3 }
   0xa   : > { %s1176_s18 = smov (%p30_p0, %s29_s18), 0  ;;  %s173_s22 = sand.u32 1, %s917_s17  }
   0xb   : > { %p984_p3 = por %p73_p2, %p72_p1  ;;  %s62_s21 = ssub.s32 %s913_s16, %s1176_s18 }
   0xc   : > { %p63_p4 = scmp.eq.s32.totalorder %s62_s21, 0  ;;  %s175_s23 = sand.u32 1, %s905_s14  }
   0xd   : > { %s636_s25 = sshll.u32 %s175_s23, 5  ;;  %s648_s26 = sshll.u32 %s913_s16, 5 }
   0xe   : > { %s994_s24 = scalar_select %p63_p4, %s905_s14, %s65_s19  }
   0xf   : > { %s182_s29 = scalar_lea.hbm %s1161_s1, %s648_s26  ;;  %s177_s30 = scalar_lea.vmem [#allocation5], %s636_s25 }
  0x10   : > { %s185_s4 = sshll.u32 %s177_s30, 4  ;;  %s183_s5 = sshll.u32 %s182_s29, 4  ;;  %s186_s4 = int_to_ptr.vmem [resolvable:$true] %s185_s4  ;;  %s184_s5 = int_to_ptr.hbm [resolvable:$true] %s183_s5 }
  0x11   : > { %p1004_p6 = pnand %p684_p5, %p984_p3  ;;  %s1008_s7 = scalar_lea.sflag [#allocation6], %s173_s22 }
  0x12   : > { %s919_s8 = smov 128   ;;  %s920_s9 = smov 8  }
  0x13   : > { %675 = dma.hbm_to_vmem [thread:$0]  (!%p1004_p6), %s184_s5, 512, %s186_s4, %s1008_s7, %s919_s8, %s919_s8, %s920_s9  }
  0x14   : > { %s1017_s10 = sadd.s32 4294967295, %s917_s17   ;;  %s632_s11 = sadd.s32 4294967294, %s917_s17  }
  0x15   : > { %p78_p7 = scmp.ne.s32.totalorder %s901_s13, %s897_s12  ;;  %p79_p8 = scmp.eq.s32.totalorder %s1017_s10, 0 }
  0x16   : > { %p130_p9 = scmp.eq.s32.totalorder %s1017_s10, 2  ;;  %p136_p10 = scmp.eq.s32.totalorder %s632_s11, 2 }
  0x17   : > { %p633_p11 = scmp.ge.s32.totalorder %s917_s17, 1  ;;  %p1027_p12 = por %p79_p8, %p78_p7 }
  0x18   : > { %p1034_p13 = por %p130_p9, %p72_p1  ;;  %p1038_p0 = por %p136_p10, %p78_p7 }
  0x19   : > { %p143_p2 = scmp.lt.s32.totalorder %s917_s17, 4  ;;  %s157_s26 = sshll.u32 %s1160_s0, 4  ;;  %s158_s26 = int_to_ptr.hbm [resolvable:$true] %s157_s26 }
  0x1a   : > { %s921_s28 = smov [#allocation2]   ;;  %s201_s5 = scalar_lea.hbm %s1162_s2, %s913_s16 }
  0x1b   : > { %p1046_p3 = pnand %p633_p11, %p143_p2  ;;  %s159_s29 = sshll.u32 %s921_s28, 4  ;;  %s160_s29 = int_to_ptr.vmem [resolvable:$true] %s159_s29 }
  0x1c   : > { %s203_s11 = sshll.u32 %s201_s5, 4  ;;  %s198_s22 = scalar_lea.vmem [#allocation7], %s175_s23  ;;  %s204_s11 = int_to_ptr.hbm [resolvable:$true] %s203_s11 }
  0x1d   : > { %p668_p1 = pneg %p1046_p3  ;;  %s205_s25 = sshll.u32 %s198_s22, 4  ;;  %s206_s25 = int_to_ptr.vmem [resolvable:$true] %s205_s25 }
  0x1e   : > { %678 = dma.hbm_to_vmem [thread:$0]  (!%p1004_p6), %s204_s11, 16, %s206_s25, %s1008_s7  }
  0x1f   : > { %p669_p4 = pnand %p668_p1, %p79_p8  ;;  %214 = sbr.rel (%p1046_p3) target bundleno = 218 (0xda), region = 32 }
  0x21   : > { %671 = dma.hbm_to_vmem [thread:$0]  (!%p669_p4), %s158_s26, 256, %s160_s29, [#allocation3], %s919_s8, %s919_s8, %s920_s9  }
  0x24   : > { %884 = dma.done.wait (%p79_p8), [#allocation3], 256  }
  0x25   : > { %886 = vsyncadd (%p79_p8), [#allocation3], 4294967040  ;;  %s221_s23 = sand.u32 1, %s1017_s10   ;;  %s1074_s28 = sand.u32 1, %s901_s13  }
  0x26   : > { %s641_s30 = sshll.u32 %s1074_s28, 5  ;;  %s222_s8 = scalar_lea.sflag [#allocation6], %s221_s23 }
  0x27   : > { %s225_s6 = scalar_lea.vmem [#allocation5], %s641_s30 }
  0x28   : > { %888 = dma.done.wait (%p1027_p12), %s222_s8, 528  }
  0x29   : > { %890 = vsyncadd (%p1027_p12), %s222_s8, 4294966768  ;;  %vm274_vm0 = vcmask 261120   ;;  %v269_v0 = vld [vmem:[%s225_s6 + $0x18] sm:$0xff]  ;;  %v268_v1 = vld [vmem:[%s225_s6 + $0x10] sm:$0xff]  ;;  %s234_s7 = scalar_lea.vmem [#allocation7], %s1074_s28  ;;  %s642_s9 = sshll.u32 %s1074_s28, 4 }
  0x2a   : > { %v267_v2 = vld [vmem:[%s225_s6 + $0x8] sm:$0xff]  ;;  %v1081_v3 = vand.u32 4294901760, %v269_v0  ;;  %v1083_v4 = vand.u32 4294901760, %v268_v1  ;;  %v266_v6 = vld [vmem:[%s225_s6] sm:$0xff]  ;;  %v265_v7 = vld [vmem:[#allocation2 + $0x8] sm:$0xff]  ;;  %s649_s10 = sshll.u32 %s909_s15, 4 }
  0x2b   : > { %v1085_v5 = vand.u32 4294901760, %v267_v2  ;;  %v264_v8 = vld [vmem:[#allocation2] sm:$0xff]  ;;  %v1087_v9 = vand.u32 4294901760, %v266_v6  ;;  %v279_v10 = vsel %vm274_vm0, %v265_v7, 0  ;;  %s513_s27 = scalar_lea.hbm %s1163_s3, %s649_s10  ;;  %s261_s29 = scalar_lea.vmem [#allocation8], %s642_s9 }
  0x2c   : > { %v276_v11 = vsel %vm274_vm0, %v264_v8, 0  ;;  %650 = vmatpush.msra.mxu2 %v1081_v3  ;;  %v331_v12 = vsub.f32 %v269_v0, %v1081_v3  ;;  %v1094_v13 = vand.u32 4294901760, %v279_v10  ;;  %v337_v14 = vsub.f32 %v268_v1, %v1083_v4  ;;  %294 = vmatpush.msra.mxu0 %v1081_v3  ;;  %v740_v39 = vld [vmem:[%s234_s7] ss:$0 sm:$0xff]  ;;  %s514_s4 = sshll.u32 %s261_s29, 4  ;;  %s516_s5 = sshll.u32 %s513_s27, 4  ;;  %s515_s4 = int_to_ptr.vmem [resolvable:$true] %s514_s4  ;;  %s517_s5 = int_to_ptr.hbm [resolvable:$true] %s516_s5 }
  0x2d   : > { %v343_v15 = vsub.f32 %v267_v2, %v1085_v5  ;;  %v349_v16 = vsub.f32 %v266_v6, %v1087_v9  ;;  %v301_v17 = vand.u32 4294901760, %v276_v11  ;;  %s500_s15 = scalar_lea.sflag [#allocation4], %s1074_s28  ;;  %s845_s11 = sshra.s32 %s517_s5, 4  ;;  %s846_s11 = int_to_ptr.hbm [resolvable:$true] %s845_s11 }
  0x2e   : > { %651 = vmatpush.msra.mxu2 %v1083_v4  ;;  %v332_v18 = vand.u32 4294901760, %v331_v12  ;;  %v310_v19 = vsub.f32 %v279_v10, %v1094_v13  ;;  %v338_v20 = vand.u32 4294901760, %v337_v14  ;;  %296 = vmatpush.msra.mxu0 %v1083_v4  ;;  %s847_s22 = scalar_lea.hbm %s846_s11, 16  ;;  %s851_s30 = scalar_lea.hbm %s1163_s3, 48 }
  0x2f   : > { %v344_v21 = vand.u32 4294901760, %v343_v15  ;;  %v350_v22 = vand.u32 4294901760, %v349_v16  ;;  %v302_v23 = vsub.f32 %v276_v11, %v301_v17  ;;  %p848_p5 = scmp.ne.s32.totalorder %s846_s11, %s847_s22  ;;  %p852_p8 = scmp.lt.s32.totalorder %s846_s11, %s1163_s3 }
  0x30   : > { %652 = vmatpush.msra.mxu2 %v1085_v5  ;;  %v333_v24 = vsub.f32 %v331_v12, %v332_v18  ;;  %v311_v25 = vand.u32 4294901760, %v310_v19  ;;  %v339_v26 = vsub.f32 %v337_v14, %v338_v20  ;;  %298 = vmatpush.msra.mxu0 %v1085_v5  ;;  %p853_p9 = scmp.lt.s32.totalorder %s851_s30, %s847_s22 }
  0x31   : > { %v345_v27 = vsub.f32 %v343_v15, %v344_v21  ;;  %v303_v28 = vand.u32 4294901760, %v302_v23  ;;  %v351_v32 = vsub.f32 %v349_v16, %v350_v22  ;;  %p849_p6 = pnand %p848_p5, %p1034_p13 }
  0x32   : > { %653 = vmatpush.msra.mxu2 %v1087_v9  ;;  %v334_v29 = vand.u32 4294901760, %v333_v24  ;;  %v312_v30 = vsub.f32 %v310_v19, %v311_v25  ;;  %v340_v31 = vand.u32 4294901760, %v339_v26  ;;  %300 = vmatpush.msra.mxu0 %v1087_v9  ;;  %p854_p10 = por %p853_p9, %p852_p8 }
  0x33   : > { %v304_v33 = vsub.f32 %v302_v23, %v303_v28  ;;  %v346_v35 = vand.u32 4294901760, %v345_v27  ;;  %v352_v37 = vand.u32 4294901760, %v351_v32  ;;  %p850_p7 = pneg %p849_p6 }
  0x34   : > { %377 = vmatpush.msrb.mxu2 %v331_v12  ;;  %446 = vmatpush.msrb.mxu0 %v332_v18  ;;  %v313_v34 = vand.u32 4294901760, %v312_v30 }
  0x35   : > { %654 = vmatpush.msra.mxu3 %v334_v29  ;;  %335 = vmatpush.msra.mxu1 %v334_v29  ;;  %v305_v36 = vand.u32 4294901760, %v304_v33  ;;  %p855_p11 = pnand %p854_p10, %p850_p7 }
  0x36   : > { %380 = vmatpush.msrb.mxu2 %v337_v14  ;;  %450 = vmatpush.msrb.mxu0 %v338_v20 }
  0x37   : > { %314 = vmatmul.f32.vlgmr.msra.gmra.mxu2 %v313_v34  ;;  %655 = vmatpush.msra.mxu3 %v340_v31 }
  0x38   : > { %383 = vmatpush.msrb.mxu2 %v343_v15  ;;  %341 = vmatpush.msra.mxu1 %v340_v31 }
  0x39   : > { %656 = vmatpush.msra.mxu3 %v346_v35  ;;  %306 = vmatmul.f32.vlgmr.msra.gmra.mxu0 %v305_v36 }
  0x3a   : > { %386 = vmatpush.msrb.mxu2 %v349_v16  ;;  %347 = vmatpush.msra.mxu1 %v346_v35 }
  0x3b   : > { %657 = vmatpush.msra.mxu3 %v352_v37  ;;  %454 = vmatpush.msrb.mxu0 %v344_v21 }
  0x3c   : > { %359 = vmatmul.f32.vlgmr.msra.gmra.mxu3 %v1094_v13  ;;  %353 = vmatpush.msra.mxu1 %v352_v37 }
  0x3d   : > { %411 = vmatpush.msrb.mxu3 %v1081_v3  ;;  %355 = vmatmul.f32.vlgmr.msra.gmra.mxu1 %v301_v17 }
  0x3e   : > { %481 = vmatpush.msrb.mxu1 %v1081_v3  ;;  %458 = vmatpush.msrb.mxu0 %v350_v22 }
  0x3f   : > { %389 = vmatmul.f32.vlgmr.msrb.gmra.mxu2 %v302_v23  ;;  %413 = vmatpush.msrb.mxu3 %v1083_v4 }
  0x40   : > { %483 = vmatpush.msrb.mxu1 %v1083_v4 }
  0x41   : > { %415 = vmatpush.msrb.mxu3 %v1085_v5  ;;  %460 = vmatmul.f32.vlgmr.msrb.gmra.mxu0 %v301_v17 }
  0x42   : > { %485 = vmatpush.msrb.mxu1 %v1085_v5 }
  0x43   : > { %417 = vmatpush.msrb.mxu3 %v1087_v9 }
  0x44   : > { %421 = vmatmul.f32.vlgmr.msrb.gmra.mxu3 %v303_v28  ;;  %487 = vmatpush.msrb.mxu1 %v1087_v9 }
  0x45   : > { %489 = vmatmul.f32.vlgmr.msrb.gmra.mxu1 %v301_v17 }
  0x47   : > { %394 = vmatmul.f32.gmra.mxu2 %v310_v19 }
  0x49   : > { %464 = vmatmul.f32.gmra.mxu0 %v1094_v13 }
  0x4c   : > { %427 = vmatmul.f32.gmra.mxu3 %v311_v25 }
  0x4d   : > { %493 = vmatmul.f32.gmra.mxu1 %v1094_v13 }
  0xb6   : > { %v307_v38 = vpop.f32.mrf.mxu0 }
  0xb7   : > { %v308_v41 = vadd.f32 %v740_v39, %v307_v38 }
  0xba   : > { %v315_v40 = vpop.f32.mrf.mxu2  ;;  %v356_v42 = vpop.f32.mrf.mxu1 }
  0xbb   : > { %v357_v44 = vadd.f32 %v356_v42, %v308_v41  ;;  %v316_v50 = vadd.f32 %v740_v39, %v315_v40 }
  0xbe   : > { %v461_v47 = vpop.f32.mrf.mxu0 }
  0xbf   : > { %v360_v43 = vpop.f32.mrf.mxu3 }
  0xc0   : > { %v361_v54 = vadd.f32 %v360_v43, %v316_v50 }
  0xc2   : > { %v390_v45 = vpop.f32.mrf.mxu2  ;;  %v490_v49 = vpop.f32.mrf.mxu1 }
  0xc3   : > { %v391_v46 = vadd.f32 %v390_v45, %v357_v44 }
  0xc6   : > { %v465_v58 = vpop.f32.mrf.mxu0 }
  0xc7   : > { %v422_v48 = vpop.f32.mrf.mxu3 }
  0xc8   : > { %v423_v51 = vadd.f32 %v422_v48, %v391_v46 }
  0xca   : > { %v462_v52 = vadd.f32 %v461_v47, %v423_v51  ;;  %v395_v53 = vpop.f32.mrf.mxu2  ;;  %v494_v60 = vpop.f32.mrf.mxu1 }
  0xcb   : > { %v396_v56 = vadd.f32 %v395_v53, %v361_v54 }
  0xcc   : > { %v491_v55 = vadd.f32 %v490_v49, %v462_v52 }
  0xce   : > { %497 = vst.msk [vmem:[%s261_s29] sm:$0xff] %vm274_vm0, %v491_v55 }
  0xcf   : > { %v428_v57 = vpop.f32.mrf.mxu3 }
  0xd0   : > { %v429_v59 = vadd.f32 %v428_v57, %v396_v56 }
  0xd2   : > { %v466_v61 = vadd.f32 %v465_v58, %v429_v59 }
  0xd4   : > { %v495_v62 = vadd.f32 %v494_v60, %v466_v61 }
  0xd6   : > { %498 = vst.msk [vmem:[%s261_s29 + $0x8] sm:$0xff] %vm274_vm0, %v495_v62 }
  0xd7   : > { %858 = shalt.err (!%p855_p11)
}
  0xd8   : > { %s922_s28 = smov 128   ;;  %s923_s7 = smov 8  }
  0xd9   : > { %666 = dma.vmem_to_hbm [thread:$0]  (%p1034_p13), %s515_s4, 256, %s517_s5, %s500_s15, %s922_s28, %s922_s28, %s923_s7  }
  0xda PF: > { %p686_p12 = scmp.ge.s32.totalorder %s917_s17, 2  ;;  %s531_s9 = sand.u32 1, %s897_s12  }
  0xdb   : > { %s532_s10 = scalar_lea.sflag [#allocation4], %s531_s9 }
  0xdc   : > { %p680_p2 = pnand %p686_p12, %p1038_p0 }
  0xde   : > { %p681_p3 = pneg %p680_p2 }
  0xe0   : > { %892 = dma.done.wait (%p681_p3), %s532_s10, 256  }
  0xe1   : > { %894 = vsyncadd (%p681_p3), %s532_s10, 4294967040  ;;  %s20_s17 = sadd.s32 1, %s917_s17   ;;  %s1170_s12 = smov %s901_s13 }
  0xe2   : > { %p17_p1 = scmp.ge.s32.totalorder %s20_s17, 5   ;;  %s1171_s13 = smov %s905_s14 }
  0xe3   : > { %s1172_s14 = smov %s994_s24  ;;  %s1173_s15 = smov %s913_s16 }
  0xe4   : > { %s1174_s16 = smov %s1176_s18  ;;  %19 = sbr.rel (!%p17_p1) target bundleno = 7 (0x7), region = 94 }
  0xe9   :  { %538 = vsyncpa [#allocation3], 1 }
  0xea   :  { %540 = vsyncpa [#allocation3 + $0x1], 1 }
  0xeb   :  { %541 = vsyncpa [#allocation6], 1 }
  0xec   :  { %543 = vsyncpa [#allocation6 + $0x1], 1 }
  0xed   :  { %544 = vsyncpa [#allocation4], 1 }
  0xee   :  { %546 = vsyncpa [#allocation4 + $0x1], 1 }

</bundles_post_ra>
